<compile_context>
chip_gen: v7x
topology: tpu7x:2x2x1
jax: 0.10.0
libtpu: 0.0.40
codegen_flags: <defaults>
</compile_context>

<pallas_src>
import functools

import jax
import jax.numpy as jnp
from jax.experimental import pallas as pl
from jax.experimental.pallas import tpu as pltpu

_SUBLANE = 8
_LANE = 128


def gru_mlp_kernel(x_ref,                      # (Bp, T*N)  flat, batch-major
                   w_ih_ref, w_hh_ref,         # (N, 3H), (H, 3H); gate order [r|z|n]
                   b_ih_ref, b_hh_ref,         # (1, 3H), (1, 3H)
                   w2_ref, b2_ref,             # (H, F2), (1, F2)
                   w3_ref, b3_ref,             # (F2, F3), (1, F3)
                   w4_ref, b4_ref,             # (F3, O), (1, O)
                   out_ref,                    # (Bp, LANE): [h | y | zero pad]
                   x_tm_ref):                  # VMEM scratch (T*Bp, N): time-major x
    Bp = x_ref.shape[0]
    N = w_ih_ref.shape[0]
    T = x_ref.shape[1] // N
    H = w_hh_ref.shape[0]
    O = w4_ref.shape[1]

    # Stage x in time-major order once (hoisted; off the serial h-chain) so the
    # whole input projection is a single MXU call and each step's slice of its
    # result is a tile-aligned static slice.
    x_all = x_ref[...]                                   # (Bp, T*N)
    for t in range(T):
        x_tm_ref[t * Bp:(t + 1) * Bp, :] = x_all[:, t * N:(t + 1) * N]

    # Hoisted input projection for all T steps: (T*Bp, N) @ (N, 3H) + b_ih.
    gi_all = (jnp.dot(x_tm_ref[...], w_ih_ref[...],
                      preferred_element_type=jnp.float32) + b_ih_ref[...])

    w_hh = w_hh_ref[...]
    b_hh = b_hh_ref[...]

    h = jnp.zeros((Bp, H), dtype=jnp.float32)

    # Fully unrolled GRU recurrence (T static): only the (Bp,H)@(H,3H) hidden
    # matmul plus gate math sits on the serial dependency chain.
    for t in range(T):
        gi = gi_all[t * Bp:(t + 1) * Bp, :]              # (Bp, 3H), tile-aligned
        gh = jnp.dot(h, w_hh, preferred_element_type=jnp.float32) + b_hh
        r = jax.nn.sigmoid(gi[:, 0:H] + gh[:, 0:H])
        z = jax.nn.sigmoid(gi[:, H:2 * H] + gh[:, H:2 * H])
        n = jnp.tanh(gi[:, 2 * H:3 * H] + r * gh[:, 2 * H:3 * H])
        h = (1.0 - z) * n + z * h

    h_sig = jax.nn.sigmoid(h)                            # h = sigmoid(gru_out[:, -1, :])

    # MLP head: sigmoid(fc2) -> sigmoid(fc3) -> fc4 (linear).
    y = jax.nn.sigmoid(jnp.dot(h_sig, w2_ref[...],
                               preferred_element_type=jnp.float32) + b2_ref[...])
    y = jax.nn.sigmoid(jnp.dot(y, w3_ref[...],
                               preferred_element_type=jnp.float32) + b3_ref[...])
    y = jnp.dot(y, w4_ref[...], preferred_element_type=jnp.float32) + b4_ref[...]

    # Single lane-dense output slab: lanes [0,H) = h, [H,H+O) = y, rest zero.
    out_ref[...] = jnp.zeros_like(out_ref)
    out_ref[:, 0:H] = h_sig.astype(out_ref.dtype)
    out_ref[:, H:H + O] = y.astype(out_ref.dtype)


@functools.partial(jax.jit, static_argnames=("t",))
def gru_forward(x, params, *, t):
    """x: (batch, t * input_num) float32. Returns (h, y) like the PyTorch module."""
    (w_ih, w_hh, b_ih, b_hh, w2, b2, w3, b3, w4, b4) = params
    batch = x.shape[0]
    n = x.shape[1] // t
    H = w_hh.shape[0]
    O = w4.shape[1]
    F2, F3 = w2.shape[1], w3.shape[1]

    bp = pl.cdiv(batch, _SUBLANE) * _SUBLANE             # pad batch to sublane width
    lanes = pl.cdiv(H + O, _LANE) * _LANE                # lane-dense packed output width
    x_p = jnp.pad(x.astype(jnp.float32), ((0, bp - batch), (0, 0)))

    flops = (2 * bp * t * n * 3 * H                      # hoisted input projection
             + 2 * bp * t * H * 3 * H                    # recurrent matmuls
             + 2 * bp * (H * F2 + F2 * F3 + F3 * O))     # MLP head
    transcendentals = bp * t * 3 * H + bp * (H + F2 + F3)
    bytes_accessed = 4 * (x_p.size + w_ih.size + w_hh.size + b_ih.size + b_hh.size
                          + w2.size + b2.size + w3.size + b3.size + w4.size + b4.size
                          + bp * lanes)

    vmem = pl.BlockSpec(memory_space=pltpu.MemorySpace.VMEM)
    # NOTE: single gridless program; everything fits VMEM at these sizes. For a
    # large batch, add a ("parallel",) grid axis over batch (feeds both v7x TCs);
    # for long sequences, stream x over a T grid instead of a whole-array block.
    out = pl.pallas_call(
        gru_mlp_kernel,
        out_shape=jax.ShapeDtypeStruct((bp, lanes), jnp.float32),
        in_specs=[vmem] * 11,
        out_specs=vmem,
        scratch_shapes=[pltpu.VMEM((t * bp, n), jnp.float32)],
        cost_estimate=pl.CostEstimate(flops=flops,
                                      transcendentals=transcendentals,
                                      bytes_accessed=bytes_accessed),
    )(x_p, w_ih, w_hh, b_ih, b_hh, w2, b2, w3, b3, w4, b4)

    h = out[:batch, 0:H]
    y = out[:batch, H:H + O]
    return h, y


def init_params(key, input_num, transmission_num, output_num):
    """PyTorch-style uniform init; weights stored pre-transposed as (in, out)."""
    H = 8                                   # nn.GRU(input_num, 8, 1): hidden hard-coded
    assert transmission_num == H, "fc2 consumes the GRU hidden state -> transmission_num must be 8"
    N, O = input_num, output_num
    F2, F3 = O * 16, O * 4
    ks = jax.random.split(key, 10)

    def u(k, shape, fan_in):
        s = 1.0 / (fan_in ** 0.5)
        return jax.random.uniform(k, shape, jnp.float32, -s, s)

    w_ih = u(ks[0], (N, 3 * H), H)          # == weight_ih_l0.T, gates [r|z|n]
    w_hh = u(ks[1], (H, 3 * H), H)          # == weight_hh_l0.T
    b_ih = u(ks[2], (1, 3 * H), H)
    b_hh = u(ks[3], (1, 3 * H), H)
    w2 = u(ks[4], (H, F2), H)               # == fc2.weight.T
    b2 = u(ks[5], (1, F2), H)
    w3 = u(ks[6], (F2, F3), F2)             # == fc3.weight.T
    b3 = u(ks[7], (1, F3), F2)
    w4 = u(ks[8], (F3, O), F3)              # == fc4.weight.T
    b4 = u(ks[9], (1, O), F3)
    return (w_ih, w_hh, b_ih, b_hh, w2, b2, w3, b3, w4, b4)


def reference_forward(x, params, *, t):
    """Pure-JAX replica of the PyTorch forward (nn.GRU + MLP head), for checking."""
    (w_ih, w_hh, b_ih, b_hh, w2, b2, w3, b3, w4, b4) = params
    batch = x.shape[0]
    H = w_hh.shape[0]
    xs = x.reshape(batch, t, -1)
    h = jnp.zeros((batch, H), jnp.float32)
    for s in range(t):
        gi = xs[:, s, :] @ w_ih + b_ih
        gh = h @ w_hh + b_hh
        r = jax.nn.sigmoid(gi[:, 0:H] + gh[:, 0:H])
        z = jax.nn.sigmoid(gi[:, H:2 * H] + gh[:, H:2 * H])
        n = jnp.tanh(gi[:, 2 * H:3 * H] + r * gh[:, 2 * H:3 * H])
        h = (1.0 - z) * n + z * h
    h_sig = jax.nn.sigmoid(h)
    y = jax.nn.sigmoid(h_sig @ w2 + b2)
    y = jax.nn.sigmoid(y @ w3 + b3)
    y = y @ w4 + b4
    return h_sig, y


if __name__ == "__main__":
    # nn.GRU hidden size is hard-coded to 8 in the module and fc2 consumes that
    # hidden state, so transmission_num must equal 8 for the forward to be valid.
    input_num, transmission_num, output_num, t = 16, 8, 4, 8
    batch = 2

    key = jax.random.PRNGKey(0)
    kx, kp = jax.random.split(key)
    # the flat (batch, t * input_num) tensor the module reshapes internally
    x = jax.random.normal(kx, (batch, t * input_num), dtype=jnp.float32)
    params = init_params(kp, input_num, transmission_num, output_num)

    h, y = gru_forward(x, params, t=t)
    jax.block_until_ready((h, y))

    h_ref, y_ref = reference_forward(x, params, t=t)
    assert h.shape == (batch, transmission_num) and y.shape == (batch, output_num)
    assert jnp.allclose(h, h_ref, atol=2e-4, rtol=2e-4), float(jnp.max(jnp.abs(h - h_ref)))
    assert jnp.allclose(y, y_ref, atol=2e-4, rtol=2e-4), float(jnp.max(jnp.abs(y - y_ref)))

    print("KERNEL_OK")
</pallas_src>

<mosaic_0001>
module attributes {stable_mosaic.version = 11 : i64} {
  func.func @gru_mlp_kernel(%arg0: memref<8x128xf32, #tpu.memory_space<vmem>>, %arg1: memref<16x24xf32, #tpu.memory_space<vmem>>, %arg2: memref<8x24xf32, #tpu.memory_space<vmem>>, %arg3: memref<1x24xf32, #tpu.memory_space<vmem>>, %arg4: memref<1x24xf32, #tpu.memory_space<vmem>>, %arg5: memref<8x64xf32, #tpu.memory_space<vmem>>, %arg6: memref<1x64xf32, #tpu.memory_space<vmem>>, %arg7: memref<64x16xf32, #tpu.memory_space<vmem>>, %arg8: memref<1x16xf32, #tpu.memory_space<vmem>>, %arg9: memref<16x4xf32, #tpu.memory_space<vmem>>, %arg10: memref<1x4xf32, #tpu.memory_space<vmem>>, %arg11: memref<8x128xf32, #tpu.memory_space<vmem>>, %arg12: memref<64x16xf32, #tpu.memory_space<vmem>>) attributes {dimension_semantics = [], scalar_prefetch = 0 : i64, scratch_operands = 1 : i64, tpu.core_type = #tpu.core_type<tc>} {
    %c0 = arith.constant 0 : index
    %c0_0 = arith.constant 0 : index
    %0 = vector.load %arg0[%c0, %c0_0] : memref<8x128xf32, #tpu.memory_space<vmem>>, vector<8x128xf32>
    %1 = vector.extract_strided_slice %0 {offsets = [0, 0], sizes = [8, 16], strides = [1, 1]} : vector<8x128xf32> to vector<8x16xf32>
    %c0_1 = arith.constant 0 : index
    %c0_2 = arith.constant 0 : index
    %2 = vector.load %arg12[%c0_1, %c0_2] : memref<64x16xf32, #tpu.memory_space<vmem>>, vector<8x16xf32>
    tpu.vector_store %arg12[%c0_1, %c0_2], %1 {strides = array<i32>} : memref<64x16xf32, #tpu.memory_space<vmem>>, vector<8x16xf32>,
    %3 = vector.extract_strided_slice %0 {offsets = [0, 16], sizes = [8, 16], strides = [1, 1]} : vector<8x128xf32> to vector<8x16xf32>
    %c8 = arith.constant 8 : index
    %c0_3 = arith.constant 0 : index
    %4 = vector.load %arg12[%c8, %c0_3] : memref<64x16xf32, #tpu.memory_space<vmem>>, vector<8x16xf32>
    tpu.vector_store %arg12[%c8, %c0_3], %3 {strides = array<i32>} : memref<64x16xf32, #tpu.memory_space<vmem>>, vector<8x16xf32>,
    %5 = vector.extract_strided_slice %0 {offsets = [0, 32], sizes = [8, 16], strides = [1, 1]} : vector<8x128xf32> to vector<8x16xf32>
    %c16 = arith.constant 16 : index
    %c0_4 = arith.constant 0 : index
    %6 = vector.load %arg12[%c16, %c0_4] : memref<64x16xf32, #tpu.memory_space<vmem>>, vector<8x16xf32>
    tpu.vector_store %arg12[%c16, %c0_4], %5 {strides = array<i32>} : memref<64x16xf32, #tpu.memory_space<vmem>>, vector<8x16xf32>,
    %7 = vector.extract_strided_slice %0 {offsets = [0, 48], sizes = [8, 16], strides = [1, 1]} : vector<8x128xf32> to vector<8x16xf32>
    %c24 = arith.constant 24 : index
    %c0_5 = arith.constant 0 : index
    %8 = vector.load %arg12[%c24, %c0_5] : memref<64x16xf32, #tpu.memory_space<vmem>>, vector<8x16xf32>
    tpu.vector_store %arg12[%c24, %c0_5], %7 {strides = array<i32>} : memref<64x16xf32, #tpu.memory_space<vmem>>, vector<8x16xf32>,
    %9 = vector.extract_strided_slice %0 {offsets = [0, 64], sizes = [8, 16], strides = [1, 1]} : vector<8x128xf32> to vector<8x16xf32>
    %c32 = arith.constant 32 : index
    %c0_6 = arith.constant 0 : index
    %10 = vector.load %arg12[%c32, %c0_6] : memref<64x16xf32, #tpu.memory_space<vmem>>, vector<8x16xf32>
    tpu.vector_store %arg12[%c32, %c0_6], %9 {strides = array<i32>} : memref<64x16xf32, #tpu.memory_space<vmem>>, vector<8x16xf32>,
    %11 = vector.extract_strided_slice %0 {offsets = [0, 80], sizes = [8, 16], strides = [1, 1]} : vector<8x128xf32> to vector<8x16xf32>
    %c40 = arith.constant 40 : index
    %c0_7 = arith.constant 0 : index
    %12 = vector.load %arg12[%c40, %c0_7] : memref<64x16xf32, #tpu.memory_space<vmem>>, vector<8x16xf32>
    tpu.vector_store %arg12[%c40, %c0_7], %11 {strides = array<i32>} : memref<64x16xf32, #tpu.memory_space<vmem>>, vector<8x16xf32>,
    %13 = vector.extract_strided_slice %0 {offsets = [0, 96], sizes = [8, 16], strides = [1, 1]} : vector<8x128xf32> to vector<8x16xf32>
    %c48 = arith.constant 48 : index
    %c0_8 = arith.constant 0 : index
    %14 = vector.load %arg12[%c48, %c0_8] : memref<64x16xf32, #tpu.memory_space<vmem>>, vector<8x16xf32>
    tpu.vector_store %arg12[%c48, %c0_8], %13 {strides = array<i32>} : memref<64x16xf32, #tpu.memory_space<vmem>>, vector<8x16xf32>,
    %15 = vector.extract_strided_slice %0 {offsets = [0, 112], sizes = [8, 16], strides = [1, 1]} : vector<8x128xf32> to vector<8x16xf32>
    %c56 = arith.constant 56 : index
    %c0_9 = arith.constant 0 : index
    %16 = vector.load %arg12[%c56, %c0_9] : memref<64x16xf32, #tpu.memory_space<vmem>>, vector<8x16xf32>
    tpu.vector_store %arg12[%c56, %c0_9], %15 {strides = array<i32>} : memref<64x16xf32, #tpu.memory_space<vmem>>, vector<8x16xf32>,
    %c0_10 = arith.constant 0 : index
    %c0_11 = arith.constant 0 : index
    %17 = vector.load %arg12[%c0_10, %c0_11] : memref<64x16xf32, #tpu.memory_space<vmem>>, vector<64x16xf32>
    %c0_12 = arith.constant 0 : index
    %c0_13 = arith.constant 0 : index
    %18 = vector.load %arg1[%c0_12, %c0_13] : memref<16x24xf32, #tpu.memory_space<vmem>>, vector<16x24xf32>
    %cst = arith.constant dense<0.000000e+00> : vector<64x24xf32>
    %19 = tpu.matmul %17, %18, %cst {dimension_numbers = #tpu.dot_dimension_numbers<[1], [0], [0], [1], [0, 0, 1, 1], [], []>} : vector<64x16xf32>, vector<16x24xf32>, vector<64x24xf32> -> vector<64x24xf32>
    %c0_14 = arith.constant 0 : index
    %c0_15 = arith.constant 0 : index
    %20 = vector.load %arg3[%c0_14, %c0_15] : memref<1x24xf32, #tpu.memory_space<vmem>>, vector<1x24xf32>
    %21 = vector.broadcast %20 : vector<1x24xf32> to vector<64x24xf32>
    %22 = arith.addf %19, %21 : vector<64x24xf32>
    %c0_16 = arith.constant 0 : index
    %c0_17 = arith.constant 0 : index
    %23 = vector.load %arg2[%c0_16, %c0_17] : memref<8x24xf32, #tpu.memory_space<vmem>>, vector<8x24xf32>
    %c0_18 = arith.constant 0 : index
    %c0_19 = arith.constant 0 : index
    %24 = vector.load %arg4[%c0_18, %c0_19] : memref<1x24xf32, #tpu.memory_space<vmem>>, vector<1x24xf32>
    %cst_20 = arith.constant 0.000000e+00 : f32
    %25 = vector.broadcast %cst_20 : f32 to vector<8x8xf32>
    %26 = vector.extract_strided_slice %22 {offsets = [0, 0], sizes = [8, 24], strides = [1, 1]} : vector<64x24xf32> to vector<8x24xf32>
    %cst_21 = arith.constant dense<0.000000e+00> : vector<8x24xf32>
    %27 = tpu.matmul %25, %23, %cst_21 {dimension_numbers = #tpu.dot_dimension_numbers<[1], [0], [0], [1], [0, 0, 1, 1], [], []>} : vector<8x8xf32>, vector<8x24xf32>, vector<8x24xf32> -> vector<8x24xf32>
    %28 = vector.broadcast %24 : vector<1x24xf32> to vector<8x24xf32>
    %29 = arith.addf %27, %28 : vector<8x24xf32>
    %30 = vector.extract_strided_slice %26 {offsets = [0, 0], sizes = [8, 8], strides = [1, 1]} : vector<8x24xf32> to vector<8x8xf32>
    %31 = vector.extract_strided_slice %29 {offsets = [0, 0], sizes = [8, 8], strides = [1, 1]} : vector<8x24xf32> to vector<8x8xf32>
    %32 = arith.addf %30, %31 : vector<8x8xf32>
    %33 = arith.negf %32 : vector<8x8xf32>
    %34 = math.exp %33 : vector<8x8xf32>
    %cst_22 = arith.constant 1.000000e+00 : f32
    %35 = vector.broadcast %cst_22 : f32 to vector<8x8xf32>
    %36 = arith.addf %35, %34 : vector<8x8xf32>
    %37 = arith.divf %35, %36 : vector<8x8xf32>
    %38 = vector.extract_strided_slice %26 {offsets = [0, 8], sizes = [8, 8], strides = [1, 1]} : vector<8x24xf32> to vector<8x8xf32>
    %39 = vector.extract_strided_slice %29 {offsets = [0, 8], sizes = [8, 8], strides = [1, 1]} : vector<8x24xf32> to vector<8x8xf32>
    %40 = arith.addf %38, %39 : vector<8x8xf32>
    %41 = arith.negf %40 : vector<8x8xf32>
    %42 = math.exp %41 : vector<8x8xf32>
    %cst_23 = arith.constant 1.000000e+00 : f32
    %43 = vector.broadcast %cst_23 : f32 to vector<8x8xf32>
    %44 = arith.addf %43, %42 : vector<8x8xf32>
    %45 = arith.divf %43, %44 : vector<8x8xf32>
    %46 = vector.extract_strided_slice %26 {offsets = [0, 16], sizes = [8, 8], strides = [1, 1]} : vector<8x24xf32> to vector<8x8xf32>
    %47 = vector.extract_strided_slice %29 {offsets = [0, 16], sizes = [8, 8], strides = [1, 1]} : vector<8x24xf32> to vector<8x8xf32>
    %48 = arith.mulf %37, %47 : vector<8x8xf32>
    %49 = arith.addf %46, %48 : vector<8x8xf32>
    %50 = math.tanh %49 : vector<8x8xf32>
    %cst_24 = arith.constant 1.000000e+00 : f32
    %51 = vector.broadcast %cst_24 : f32 to vector<8x8xf32>
    %52 = arith.subf %51, %45 : vector<8x8xf32>
    %53 = arith.mulf %52, %50 : vector<8x8xf32>
    %54 = arith.mulf %45, %25 : vector<8x8xf32>
    %55 = arith.addf %53, %54 : vector<8x8xf32>
    %56 = vector.extract_strided_slice %22 {offsets = [8, 0], sizes = [8, 24], strides = [1, 1]} : vector<64x24xf32> to vector<8x24xf32>
    %cst_25 = arith.constant dense<0.000000e+00> : vector<8x24xf32>
    %57 = tpu.matmul %55, %23, %cst_25 {dimension_numbers = #tpu.dot_dimension_numbers<[1], [0], [0], [1], [0, 0, 1, 1], [], []>} : vector<8x8xf32>, vector<8x24xf32>, vector<8x24xf32> -> vector<8x24xf32>
    %58 = vector.broadcast %24 : vector<1x24xf32> to vector<8x24xf32>
    %59 = arith.addf %57, %58 : vector<8x24xf32>
    %60 = vector.extract_strided_slice %56 {offsets = [0, 0], sizes = [8, 8], strides = [1, 1]} : vector<8x24xf32> to vector<8x8xf32>
    %61 = vector.extract_strided_slice %59 {offsets = [0, 0], sizes = [8, 8], strides = [1, 1]} : vector<8x24xf32> to vector<8x8xf32>
    %62 = arith.addf %60, %61 : vector<8x8xf32>
    %63 = arith.negf %62 : vector<8x8xf32>
    %64 = math.exp %63 : vector<8x8xf32>
    %cst_26 = arith.constant 1.000000e+00 : f32
    %65 = vector.broadcast %cst_26 : f32 to vector<8x8xf32>
    %66 = arith.addf %65, %64 : vector<8x8xf32>
    %67 = arith.divf %65, %66 : vector<8x8xf32>
    %68 = vector.extract_strided_slice %56 {offsets = [0, 8], sizes = [8, 8], strides = [1, 1]} : vector<8x24xf32> to vector<8x8xf32>
    %69 = vector.extract_strided_slice %59 {offsets = [0, 8], sizes = [8, 8], strides = [1, 1]} : vector<8x24xf32> to vector<8x8xf32>
    %70 = arith.addf %68, %69 : vector<8x8xf32>
    %71 = arith.negf %70 : vector<8x8xf32>
    %72 = math.exp %71 : vector<8x8xf32>
    %cst_27 = arith.constant 1.000000e+00 : f32
    %73 = vector.broadcast %cst_27 : f32 to vector<8x8xf32>
    %74 = arith.addf %73, %72 : vector<8x8xf32>
    %75 = arith.divf %73, %74 : vector<8x8xf32>
    %76 = vector.extract_strided_slice %56 {offsets = [0, 16], sizes = [8, 8], strides = [1, 1]} : vector<8x24xf32> to vector<8x8xf32>
    %77 = vector.extract_strided_slice %59 {offsets = [0, 16], sizes = [8, 8], strides = [1, 1]} : vector<8x24xf32> to vector<8x8xf32>
    %78 = arith.mulf %67, %77 : vector<8x8xf32>
    %79 = arith.addf %76, %78 : vector<8x8xf32>
    %80 = math.tanh %79 : vector<8x8xf32>
    %cst_28 = arith.constant 1.000000e+00 : f32
    %81 = vector.broadcast %cst_28 : f32 to vector<8x8xf32>
    %82 = arith.subf %81, %75 : vector<8x8xf32>
    %83 = arith.mulf %82, %80 : vector<8x8xf32>
    %84 = arith.mulf %75, %55 : vector<8x8xf32>
    %85 = arith.addf %83, %84 : vector<8x8xf32>
    %86 = vector.extract_strided_slice %22 {offsets = [16, 0], sizes = [8, 24], strides = [1, 1]} : vector<64x24xf32> to vector<8x24xf32>
    %cst_29 = arith.constant dense<0.000000e+00> : vector<8x24xf32>
    %87 = tpu.matmul %85, %23, %cst_29 {dimension_numbers = #tpu.dot_dimension_numbers<[1], [0], [0], [1], [0, 0, 1, 1], [], []>} : vector<8x8xf32>, vector<8x24xf32>, vector<8x24xf32> -> vector<8x24xf32>
    %88 = vector.broadcast %24 : vector<1x24xf32> to vector<8x24xf32>
    %89 = arith.addf %87, %88 : vector<8x24xf32>
    %90 = vector.extract_strided_slice %86 {offsets = [0, 0], sizes = [8, 8], strides = [1, 1]} : vector<8x24xf32> to vector<8x8xf32>
    %91 = vector.extract_strided_slice %89 {offsets = [0, 0], sizes = [8, 8], strides = [1, 1]} : vector<8x24xf32> to vector<8x8xf32>
    %92 = arith.addf %90, %91 : vector<8x8xf32>
    %93 = arith.negf %92 : vector<8x8xf32>
    %94 = math.exp %93 : vector<8x8xf32>
    %cst_30 = arith.constant 1.000000e+00 : f32
    %95 = vector.broadcast %cst_30 : f32 to vector<8x8xf32>
    %96 = arith.addf %95, %94 : vector<8x8xf32>
    %97 = arith.divf %95, %96 : vector<8x8xf32>
    %98 = vector.extract_strided_slice %86 {offsets = [0, 8], sizes = [8, 8], strides = [1, 1]} : vector<8x24xf32> to vector<8x8xf32>
    %99 = vector.extract_strided_slice %89 {offsets = [0, 8], sizes = [8, 8], strides = [1, 1]} : vector<8x24xf32> to vector<8x8xf32>
    %100 = arith.addf %98, %99 : vector<8x8xf32>
    %101 = arith.negf %100 : vector<8x8xf32>
    %102 = math.exp %101 : vector<8x8xf32>
    %cst_31 = arith.constant 1.000000e+00 : f32
    %103 = vector.broadcast %cst_31 : f32 to vector<8x8xf32>
    %104 = arith.addf %103, %102 : vector<8x8xf32>
    %105 = arith.divf %103, %104 : vector<8x8xf32>
    %106 = vector.extract_strided_slice %86 {offsets = [0, 16], sizes = [8, 8], strides = [1, 1]} : vector<8x24xf32> to vector<8x8xf32>
    %107 = vector.extract_strided_slice %89 {offsets = [0, 16], sizes = [8, 8], strides = [1, 1]} : vector<8x24xf32> to vector<8x8xf32>
    %108 = arith.mulf %97, %107 : vector<8x8xf32>
    %109 = arith.addf %106, %108 : vector<8x8xf32>
    %110 = math.tanh %109 : vector<8x8xf32>
    %cst_32 = arith.constant 1.000000e+00 : f32
    %111 = vector.broadcast %cst_32 : f32 to vector<8x8xf32>
    %112 = arith.subf %111, %105 : vector<8x8xf32>
    %113 = arith.mulf %112, %110 : vector<8x8xf32>
    %114 = arith.mulf %105, %85 : vector<8x8xf32>
    %115 = arith.addf %113, %114 : vector<8x8xf32>
    %116 = vector.extract_strided_slice %22 {offsets = [24, 0], sizes = [8, 24], strides = [1, 1]} : vector<64x24xf32> to vector<8x24xf32>
    %cst_33 = arith.constant dense<0.000000e+00> : vector<8x24xf32>
    %117 = tpu.matmul %115, %23, %cst_33 {dimension_numbers = #tpu.dot_dimension_numbers<[1], [0], [0], [1], [0, 0, 1, 1], [], []>} : vector<8x8xf32>, vector<8x24xf32>, vector<8x24xf32> -> vector<8x24xf32>
    %118 = vector.broadcast %24 : vector<1x24xf32> to vector<8x24xf32>
    %119 = arith.addf %117, %118 : vector<8x24xf32>
    %120 = vector.extract_strided_slice %116 {offsets = [0, 0], sizes = [8, 8], strides = [1, 1]} : vector<8x24xf32> to vector<8x8xf32>
    %121 = vector.extract_strided_slice %119 {offsets = [0, 0], sizes = [8, 8], strides = [1, 1]} : vector<8x24xf32> to vector<8x8xf32>
    %122 = arith.addf %120, %121 : vector<8x8xf32>
    %123 = arith.negf %122 : vector<8x8xf32>
    %124 = math.exp %123 : vector<8x8xf32>
    %cst_34 = arith.constant 1.000000e+00 : f32
    %125 = vector.broadcast %cst_34 : f32 to vector<8x8xf32>
    %126 = arith.addf %125, %124 : vector<8x8xf32>
    %127 = arith.divf %125, %126 : vector<8x8xf32>
    %128 = vector.extract_strided_slice %116 {offsets = [0, 8], sizes = [8, 8], strides = [1, 1]} : vector<8x24xf32> to vector<8x8xf32>
    %129 = vector.extract_strided_slice %119 {offsets = [0, 8], sizes = [8, 8], strides = [1, 1]} : vector<8x24xf32> to vector<8x8xf32>
    %130 = arith.addf %128, %129 : vector<8x8xf32>
    %131 = arith.negf %130 : vector<8x8xf32>
    %132 = math.exp %131 : vector<8x8xf32>
    %cst_35 = arith.constant 1.000000e+00 : f32
    %133 = vector.broadcast %cst_35 : f32 to vector<8x8xf32>
    %134 = arith.addf %133, %132 : vector<8x8xf32>
    %135 = arith.divf %133, %134 : vector<8x8xf32>
    %136 = vector.extract_strided_slice %116 {offsets = [0, 16], sizes = [8, 8], strides = [1, 1]} : vector<8x24xf32> to vector<8x8xf32>
    %137 = vector.extract_strided_slice %119 {offsets = [0, 16], sizes = [8, 8], strides = [1, 1]} : vector<8x24xf32> to vector<8x8xf32>
    %138 = arith.mulf %127, %137 : vector<8x8xf32>
    %139 = arith.addf %136, %138 : vector<8x8xf32>
    %140 = math.tanh %139 : vector<8x8xf32>
    %cst_36 = arith.constant 1.000000e+00 : f32
    %141 = vector.broadcast %cst_36 : f32 to vector<8x8xf32>
    %142 = arith.subf %141, %135 : vector<8x8xf32>
    %143 = arith.mulf %142, %140 : vector<8x8xf32>
    %144 = arith.mulf %135, %115 : vector<8x8xf32>
    %145 = arith.addf %143, %144 : vector<8x8xf32>
    %146 = vector.extract_strided_slice %22 {offsets = [32, 0], sizes = [8, 24], strides = [1, 1]} : vector<64x24xf32> to vector<8x24xf32>
    %cst_37 = arith.constant dense<0.000000e+00> : vector<8x24xf32>
    %147 = tpu.matmul %145, %23, %cst_37 {dimension_numbers = #tpu.dot_dimension_numbers<[1], [0], [0], [1], [0, 0, 1, 1], [], []>} : vector<8x8xf32>, vector<8x24xf32>, vector<8x24xf32> -> vector<8x24xf32>
    %148 = vector.broadcast %24 : vector<1x24xf32> to vector<8x24xf32>
    %149 = arith.addf %147, %148 : vector<8x24xf32>
    %150 = vector.extract_strided_slice %146 {offsets = [0, 0], sizes = [8, 8], strides = [1, 1]} : vector<8x24xf32> to vector<8x8xf32>
    %151 = vector.extract_strided_slice %149 {offsets = [0, 0], sizes = [8, 8], strides = [1, 1]} : vector<8x24xf32> to vector<8x8xf32>
    %152 = arith.addf %150, %151 : vector<8x8xf32>
    %153 = arith.negf %152 : vector<8x8xf32>
    %154 = math.exp %153 : vector<8x8xf32>
    %cst_38 = arith.constant 1.000000e+00 : f32
    %155 = vector.broadcast %cst_38 : f32 to vector<8x8xf32>
    %156 = arith.addf %155, %154 : vector<8x8xf32>
    %157 = arith.divf %155, %156 : vector<8x8xf32>
    %158 = vector.extract_strided_slice %146 {offsets = [0, 8], sizes = [8, 8], strides = [1, 1]} : vector<8x24xf32> to vector<8x8xf32>
    %159 = vector.extract_strided_slice %149 {offsets = [0, 8], sizes = [8, 8], strides = [1, 1]} : vector<8x24xf32> to vector<8x8xf32>
    %160 = arith.addf %158, %159 : vector<8x8xf32>
    %161 = arith.negf %160 : vector<8x8xf32>
    %162 = math.exp %161 : vector<8x8xf32>
    %cst_39 = arith.constant 1.000000e+00 : f32
    %163 = vector.broadcast %cst_39 : f32 to vector<8x8xf32>
    %164 = arith.addf %163, %162 : vector<8x8xf32>
    %165 = arith.divf %163, %164 : vector<8x8xf32>
    %166 = vector.extract_strided_slice %146 {offsets = [0, 16], sizes = [8, 8], strides = [1, 1]} : vector<8x24xf32> to vector<8x8xf32>
    %167 = vector.extract_strided_slice %149 {offsets = [0, 16], sizes = [8, 8], strides = [1, 1]} : vector<8x24xf32> to vector<8x8xf32>
    %168 = arith.mulf %157, %167 : vector<8x8xf32>
    %169 = arith.addf %166, %168 : vector<8x8xf32>
    %170 = math.tanh %169 : vector<8x8xf32>
    %cst_40 = arith.constant 1.000000e+00 : f32
    %171 = vector.broadcast %cst_40 : f32 to vector<8x8xf32>
    %172 = arith.subf %171, %165 : vector<8x8xf32>
    %173 = arith.mulf %172, %170 : vector<8x8xf32>
    %174 = arith.mulf %165, %145 : vector<8x8xf32>
    %175 = arith.addf %173, %174 : vector<8x8xf32>
    %176 = vector.extract_strided_slice %22 {offsets = [40, 0], sizes = [8, 24], strides = [1, 1]} : vector<64x24xf32> to vector<8x24xf32>
    %cst_41 = arith.constant dense<0.000000e+00> : vector<8x24xf32>
    %177 = tpu.matmul %175, %23, %cst_41 {dimension_numbers = #tpu.dot_dimension_numbers<[1], [0], [0], [1], [0, 0, 1, 1], [], []>} : vector<8x8xf32>, vector<8x24xf32>, vector<8x24xf32> -> vector<8x24xf32>
    %178 = vector.broadcast %24 : vector<1x24xf32> to vector<8x24xf32>
    %179 = arith.addf %177, %178 : vector<8x24xf32>
    %180 = vector.extract_strided_slice %176 {offsets = [0, 0], sizes = [8, 8], strides = [1, 1]} : vector<8x24xf32> to vector<8x8xf32>
    %181 = vector.extract_strided_slice %179 {offsets = [0, 0], sizes = [8, 8], strides = [1, 1]} : vector<8x24xf32> to vector<8x8xf32>
    %182 = arith.addf %180, %181 : vector<8x8xf32>
    %183 = arith.negf %182 : vector<8x8xf32>
    %184 = math.exp %183 : vector<8x8xf32>
    %cst_42 = arith.constant 1.000000e+00 : f32
    %185 = vector.broadcast %cst_42 : f32 to vector<8x8xf32>
    %186 = arith.addf %185, %184 : vector<8x8xf32>
    %187 = arith.divf %185, %186 : vector<8x8xf32>
    %188 = vector.extract_strided_slice %176 {offsets = [0, 8], sizes = [8, 8], strides = [1, 1]} : vector<8x24xf32> to vector<8x8xf32>
    %189 = vector.extract_strided_slice %179 {offsets = [0, 8], sizes = [8, 8], strides = [1, 1]} : vector<8x24xf32> to vector<8x8xf32>
    %190 = arith.addf %188, %189 : vector<8x8xf32>
    %191 = arith.negf %190 : vector<8x8xf32>
    %192 = math.exp %191 : vector<8x8xf32>
    %cst_43 = arith.constant 1.000000e+00 : f32
    %193 = vector.broadcast %cst_43 : f32 to vector<8x8xf32>
    %194 = arith.addf %193, %192 : vector<8x8xf32>
    %195 = arith.divf %193, %194 : vector<8x8xf32>
    %196 = vector.extract_strided_slice %176 {offsets = [0, 16], sizes = [8, 8], strides = [1, 1]} : vector<8x24xf32> to vector<8x8xf32>
    %197 = vector.extract_strided_slice %179 {offsets = [0, 16], sizes = [8, 8], strides = [1, 1]} : vector<8x24xf32> to vector<8x8xf32>
    %198 = arith.mulf %187, %197 : vector<8x8xf32>
    %199 = arith.addf %196, %198 : vector<8x8xf32>
    %200 = math.tanh %199 : vector<8x8xf32>
    %cst_44 = arith.constant 1.000000e+00 : f32
    %201 = vector.broadcast %cst_44 : f32 to vector<8x8xf32>
    %202 = arith.subf %201, %195 : vector<8x8xf32>
    %203 = arith.mulf %202, %200 : vector<8x8xf32>
    %204 = arith.mulf %195, %175 : vector<8x8xf32>
    %205 = arith.addf %203, %204 : vector<8x8xf32>
    %206 = vector.extract_strided_slice %22 {offsets = [48, 0], sizes = [8, 24], strides = [1, 1]} : vector<64x24xf32> to vector<8x24xf32>
    %cst_45 = arith.constant dense<0.000000e+00> : vector<8x24xf32>
    %207 = tpu.matmul %205, %23, %cst_45 {dimension_numbers = #tpu.dot_dimension_numbers<[1], [0], [0], [1], [0, 0, 1, 1], [], []>} : vector<8x8xf32>, vector<8x24xf32>, vector<8x24xf32> -> vector<8x24xf32>
    %208 = vector.broadcast %24 : vector<1x24xf32> to vector<8x24xf32>
    %209 = arith.addf %207, %208 : vector<8x24xf32>
    %210 = vector.extract_strided_slice %206 {offsets = [0, 0], sizes = [8, 8], strides = [1, 1]} : vector<8x24xf32> to vector<8x8xf32>
    %211 = vector.extract_strided_slice %209 {offsets = [0, 0], sizes = [8, 8], strides = [1, 1]} : vector<8x24xf32> to vector<8x8xf32>
    %212 = arith.addf %210, %211 : vector<8x8xf32>
    %213 = arith.negf %212 : vector<8x8xf32>
    %214 = math.exp %213 : vector<8x8xf32>
    %cst_46 = arith.constant 1.000000e+00 : f32
    %215 = vector.broadcast %cst_46 : f32 to vector<8x8xf32>
    %216 = arith.addf %215, %214 : vector<8x8xf32>
    %217 = arith.divf %215, %216 : vector<8x8xf32>
    %218 = vector.extract_strided_slice %206 {offsets = [0, 8], sizes = [8, 8], strides = [1, 1]} : vector<8x24xf32> to vector<8x8xf32>
    %219 = vector.extract_strided_slice %209 {offsets = [0, 8], sizes = [8, 8], strides = [1, 1]} : vector<8x24xf32> to vector<8x8xf32>
    %220 = arith.addf %218, %219 : vector<8x8xf32>
    %221 = arith.negf %220 : vector<8x8xf32>
    %222 = math.exp %221 : vector<8x8xf32>
    %cst_47 = arith.constant 1.000000e+00 : f32
    %223 = vector.broadcast %cst_47 : f32 to vector<8x8xf32>
    %224 = arith.addf %223, %222 : vector<8x8xf32>
    %225 = arith.divf %223, %224 : vector<8x8xf32>
    %226 = vector.extract_strided_slice %206 {offsets = [0, 16], sizes = [8, 8], strides = [1, 1]} : vector<8x24xf32> to vector<8x8xf32>
    %227 = vector.extract_strided_slice %209 {offsets = [0, 16], sizes = [8, 8], strides = [1, 1]} : vector<8x24xf32> to vector<8x8xf32>
    %228 = arith.mulf %217, %227 : vector<8x8xf32>
    %229 = arith.addf %226, %228 : vector<8x8xf32>
    %230 = math.tanh %229 : vector<8x8xf32>
    %cst_48 = arith.constant 1.000000e+00 : f32
    %231 = vector.broadcast %cst_48 : f32 to vector<8x8xf32>
    %232 = arith.subf %231, %225 : vector<8x8xf32>
    %233 = arith.mulf %232, %230 : vector<8x8xf32>
    %234 = arith.mulf %225, %205 : vector<8x8xf32>
    %235 = arith.addf %233, %234 : vector<8x8xf32>
    %236 = vector.extract_strided_slice %22 {offsets = [56, 0], sizes = [8, 24], strides = [1, 1]} : vector<64x24xf32> to vector<8x24xf32>
    %cst_49 = arith.constant dense<0.000000e+00> : vector<8x24xf32>
    %237 = tpu.matmul %235, %23, %cst_49 {dimension_numbers = #tpu.dot_dimension_numbers<[1], [0], [0], [1], [0, 0, 1, 1], [], []>} : vector<8x8xf32>, vector<8x24xf32>, vector<8x24xf32> -> vector<8x24xf32>
    %238 = vector.broadcast %24 : vector<1x24xf32> to vector<8x24xf32>
    %239 = arith.addf %237, %238 : vector<8x24xf32>
    %240 = vector.extract_strided_slice %236 {offsets = [0, 0], sizes = [8, 8], strides = [1, 1]} : vector<8x24xf32> to vector<8x8xf32>
    %241 = vector.extract_strided_slice %239 {offsets = [0, 0], sizes = [8, 8], strides = [1, 1]} : vector<8x24xf32> to vector<8x8xf32>
    %242 = arith.addf %240, %241 : vector<8x8xf32>
    %243 = arith.negf %242 : vector<8x8xf32>
    %244 = math.exp %243 : vector<8x8xf32>
    %cst_50 = arith.constant 1.000000e+00 : f32
    %245 = vector.broadcast %cst_50 : f32 to vector<8x8xf32>
    %246 = arith.addf %245, %244 : vector<8x8xf32>
    %247 = arith.divf %245, %246 : vector<8x8xf32>
    %248 = vector.extract_strided_slice %236 {offsets = [0, 8], sizes = [8, 8], strides = [1, 1]} : vector<8x24xf32> to vector<8x8xf32>
    %249 = vector.extract_strided_slice %239 {offsets = [0, 8], sizes = [8, 8], strides = [1, 1]} : vector<8x24xf32> to vector<8x8xf32>
    %250 = arith.addf %248, %249 : vector<8x8xf32>
    %251 = arith.negf %250 : vector<8x8xf32>
    %252 = math.exp %251 : vector<8x8xf32>
    %cst_51 = arith.constant 1.000000e+00 : f32
    %253 = vector.broadcast %cst_51 : f32 to vector<8x8xf32>
    %254 = arith.addf %253, %252 : vector<8x8xf32>
    %255 = arith.divf %253, %254 : vector<8x8xf32>
    %256 = vector.extract_strided_slice %236 {offsets = [0, 16], sizes = [8, 8], strides = [1, 1]} : vector<8x24xf32> to vector<8x8xf32>
    %257 = vector.extract_strided_slice %239 {offsets = [0, 16], sizes = [8, 8], strides = [1, 1]} : vector<8x24xf32> to vector<8x8xf32>
    %258 = arith.mulf %247, %257 : vector<8x8xf32>
    %259 = arith.addf %256, %258 : vector<8x8xf32>
    %260 = math.tanh %259 : vector<8x8xf32>
    %cst_52 = arith.constant 1.000000e+00 : f32
    %261 = vector.broadcast %cst_52 : f32 to vector<8x8xf32>
    %262 = arith.subf %261, %255 : vector<8x8xf32>
    %263 = arith.mulf %262, %260 : vector<8x8xf32>
    %264 = arith.mulf %255, %235 : vector<8x8xf32>
    %265 = arith.addf %263, %264 : vector<8x8xf32>
    %266 = arith.negf %265 : vector<8x8xf32>
    %267 = math.exp %266 : vector<8x8xf32>
    %cst_53 = arith.constant 1.000000e+00 : f32
    %268 = vector.broadcast %cst_53 : f32 to vector<8x8xf32>
    %269 = arith.addf %268, %267 : vector<8x8xf32>
    %270 = arith.divf %268, %269 : vector<8x8xf32>
    %c0_54 = arith.constant 0 : index
    %c0_55 = arith.constant 0 : index
    %271 = vector.load %arg5[%c0_54, %c0_55] : memref<8x64xf32, #tpu.memory_space<vmem>>, vector<8x64xf32>
    %cst_56 = arith.constant dense<0.000000e+00> : vector<8x64xf32>
    %272 = tpu.matmul %270, %271, %cst_56 {dimension_numbers = #tpu.dot_dimension_numbers<[1], [0], [0], [1], [0, 0, 1, 1], [], []>} : vector<8x8xf32>, vector<8x64xf32>, vector<8x64xf32> -> vector<8x64xf32>
    %c0_57 = arith.constant 0 : index
    %c0_58 = arith.constant 0 : index
    %273 = vector.load %arg6[%c0_57, %c0_58] : memref<1x64xf32, #tpu.memory_space<vmem>>, vector<1x64xf32>
    %274 = vector.broadcast %273 : vector<1x64xf32> to vector<8x64xf32>
    %275 = arith.addf %272, %274 : vector<8x64xf32>
    %276 = arith.negf %275 : vector<8x64xf32>
    %277 = math.exp %276 : vector<8x64xf32>
    %cst_59 = arith.constant 1.000000e+00 : f32
    %278 = vector.broadcast %cst_59 : f32 to vector<8x64xf32>
    %279 = arith.addf %278, %277 : vector<8x64xf32>
    %280 = arith.divf %278, %279 : vector<8x64xf32>
    %c0_60 = arith.constant 0 : index
    %c0_61 = arith.constant 0 : index
    %281 = vector.load %arg7[%c0_60, %c0_61] : memref<64x16xf32, #tpu.memory_space<vmem>>, vector<64x16xf32>
    %cst_62 = arith.constant dense<0.000000e+00> : vector<8x16xf32>
    %282 = tpu.matmul %280, %281, %cst_62 {dimension_numbers = #tpu.dot_dimension_numbers<[1], [0], [0], [1], [0, 0, 1, 1], [], []>} : vector<8x64xf32>, vector<64x16xf32>, vector<8x16xf32> -> vector<8x16xf32>
    %c0_63 = arith.constant 0 : index
    %c0_64 = arith.constant 0 : index
    %283 = vector.load %arg8[%c0_63, %c0_64] : memref<1x16xf32, #tpu.memory_space<vmem>>, vector<1x16xf32>
    %284 = vector.broadcast %283 : vector<1x16xf32> to vector<8x16xf32>
    %285 = arith.addf %282, %284 : vector<8x16xf32>
    %286 = arith.negf %285 : vector<8x16xf32>
    %287 = math.exp %286 : vector<8x16xf32>
    %cst_65 = arith.constant 1.000000e+00 : f32
    %288 = vector.broadcast %cst_65 : f32 to vector<8x16xf32>
    %289 = arith.addf %288, %287 : vector<8x16xf32>
    %290 = arith.divf %288, %289 : vector<8x16xf32>
    %c0_66 = arith.constant 0 : index
    %c0_67 = arith.constant 0 : index
    %291 = vector.load %arg9[%c0_66, %c0_67] : memref<16x4xf32, #tpu.memory_space<vmem>>, vector<16x4xf32>
    %cst_68 = arith.constant dense<0.000000e+00> : vector<8x4xf32>
    %292 = tpu.matmul %290, %291, %cst_68 {dimension_numbers = #tpu.dot_dimension_numbers<[1], [0], [0], [1], [0, 0, 1, 1], [], []>} : vector<8x16xf32>, vector<16x4xf32>, vector<8x4xf32> -> vector<8x4xf32>
    %c0_69 = arith.constant 0 : index
    %c0_70 = arith.constant 0 : index
    %293 = vector.load %arg10[%c0_69, %c0_70] : memref<1x4xf32, #tpu.memory_space<vmem>>, vector<1x4xf32>
    %294 = vector.broadcast %293 : vector<1x4xf32> to vector<8x4xf32>
    %295 = arith.addf %292, %294 : vector<8x4xf32>
    %cst_71 = arith.constant 0.000000e+00 : f32
    %296 = vector.broadcast %cst_71 : f32 to vector<8x128xf32>
    %c0_72 = arith.constant 0 : index
    %c0_73 = arith.constant 0 : index
    %297 = vector.load %arg11[%c0_72, %c0_73] : memref<8x128xf32, #tpu.memory_space<vmem>>, vector<8x128xf32>
    tpu.vector_store %arg11[%c0_72, %c0_73], %296 {strides = array<i32>} : memref<8x128xf32, #tpu.memory_space<vmem>>, vector<8x128xf32>,
    %c0_74 = arith.constant 0 : index
    %c0_75 = arith.constant 0 : index
    %298 = vector.load %arg11[%c0_74, %c0_75] : memref<8x128xf32, #tpu.memory_space<vmem>>, vector<8x8xf32>
    tpu.vector_store %arg11[%c0_74, %c0_75], %270 {strides = array<i32>} : memref<8x128xf32, #tpu.memory_space<vmem>>, vector<8x8xf32>,
    %c0_76 = arith.constant 0 : index
    %c8_77 = arith.constant 8 : index
    %299 = vector.load %arg11[%c0_76, %c8_77] : memref<8x128xf32, #tpu.memory_space<vmem>>, vector<8x4xf32>
    tpu.vector_store %arg11[%c0_76, %c8_77], %295 {strides = array<i32>} : memref<8x128xf32, #tpu.memory_space<vmem>>, vector<8x4xf32>,
    return
  }
}

</mosaic_0001>

<bundles_post_ra>
// kernel: gru_forward.1
= control target key start
LH: loop header
LB: loop body
LE: loop exit
PB: predicated region body
PF: predicated region fallthrough
CT: control target
= control target key end

     0   :  { %vm39_vm0 = vcmask 130048   ;;  %s1570_s23 = smov 32   ;;  %s1571_s24 = smov 112   ;;  %v1573_v4 = vmov 0.0   ;;  %vm1574_vm1 = vmmov 0   ;;  %vm224_vm2 = vcmask 64512   ;;  %s1850_s0 = inlined_call_operand.vmem [shape: f32[8,128], index: 0, kind: input, shape index: {}]   ;;  %s1851_s1 = inlined_call_operand.vmem [shape: f32[16,24], index: 1, kind: input, shape index: {}]   ;;  %s1852_s2 = inlined_call_operand.vmem [shape: f32[8,24], index: 2, kind: input, shape index: {}]   ;;  %s1853_s4 = inlined_call_operand.vmem [shape: f32[1,24], index: 4, kind: input, shape index: {}]   ;;  %s1854_s3 = inlined_call_operand.vmem [shape: f32[1,24], index: 3, kind: input, shape index: {}]   ;;  %s1855_s5 = inlined_call_operand.vmem [shape: f32[8,64], index: 5, kind: input, shape index: {}]   ;;  %s1856_s11 = inlined_call_operand.vmem [shape: f32[8,128], index: 11, kind: output, shape index: {}]   ;;  %s1857_s7 = inlined_call_operand.vmem [shape: f32[64,16], index: 7, kind: input, shape index: {}]   ;;  %s1858_s6 = inlined_call_operand.vmem [shape: f32[1,64], index: 6, kind: input, shape index: {}]   ;;  %s1859_s9 = inlined_call_operand.vmem [shape: f32[16,4], index: 9, kind: input, shape index: {}]   ;;  %s1860_s8 = inlined_call_operand.vmem [shape: f32[1,16], index: 8, kind: input, shape index: {}]   ;;  %s1861_s10 = inlined_call_operand.vmem [shape: f32[1,4], index: 10, kind: input, shape index: {}]  }
   0x1   :  { %v1645_v0 = vld [vmem:[%s1850_s0] sm:$0xff]  ;;  %v79_v2 = vld [vmem:[%s1851_s1 + $0x8] sm:$0xff]  ;;  %s1572_s0 = smov 16   ;;  %s1577_s29 = smov 80   ;;  %1303 = vst [vmem:[%s1856_s11] sm:$0xff] %v1573_v4  ;;  %vm1141_vm3 = vcmask 523264   ;;  %vm1310_vm4 = vcmask 97344  }
   0x2   :  { %v78_v1 = vld [vmem:[%s1851_s1] sm:$0xff]  ;;  %62 = vrot.lane.b32.xlu0 %v1645_v0, %s1570_s23  ;;  %40 = vst.msk [vmem:[#allocation2] sm:$0xff] %vm39_vm0, %v1645_v0  ;;  %42 = vrot.lane.b32.xlu1 %v1645_v0, %s1571_s24  ;;  %s1578_s30 = smov 64   ;;  %s1579_s12 = smov 48  }
   0x3   :  { %v1477_v3 = vpack.c.bf16 %v79_v2, %v78_v1  ;;  %v1670_v11 = vld [vmem:[%s1852_s2] sm:$0xff] }
   0x4   :  { %v1692_v17 = vld [vmem:[%s1853_s4] ss:$0 sm:$0xff]  ;;  %s1575_s4 = smov 120  }
   0x5   :  { %1496 = vmatprep.subr.bf16.mxu1 %v1477_v3  ;;  %1478 = vmatprep.subr.bf16.mxu0 %v1477_v3  ;;  %v1699_v21 = vld [vmem:[%s1854_s3] ss:$0 sm:$0xff]  ;;  %s1576_s3 = smov 96  }
   0x6   :  { %1497 = vmatpush3.bf16.msra.mxu1 %v1477_v3  ;;  %1480 = vmatpush3.bf16.msra.mxu0 %v1477_v3 }
   0x7   :  { %66 = vrot.lane.b32.xlu0 %v1645_v0, %s1572_s0  ;;  %1406 = vmatprep.subr.mxu1 %v1573_v4 }
   0x8   :  { %1431 = vmatprep.subr.mxu0 %v1573_v4 }
   0x9   :  { %v70_v5 = vld [vmem:[#allocation2] sm:$0xff] }
   0xa   :  { %1394 = vmatprep.mubr.msk.f32.mxu0 %vm39_vm0, %v70_v5 }
  0x74   :  { %v63_v6 = vpop.permute.xlu0 %62  ;;  %v43_v7 = vpop.permute.xlu1 %42 }
  0x75   :  { %65 = vst.msk [vmem:[#allocation2 + $0x30] sm:$0xff] %vm39_vm0, %v63_v6  ;;  %45 = vst.msk [vmem:[#allocation2 + $0x8] sm:$0xff] %vm39_vm0, %v43_v7 }
  0x79   :  { %v67_v8 = vpop.permute.xlu0 %66 }
  0x7a   :  { %69 = vst.msk [vmem:[#allocation2 + $0x38] sm:$0xff] %vm39_vm0, %v67_v8 }
  0x7c   :  { %v76_v9 = vld [vmem:[#allocation2 + $0x30] sm:$0xff]  ;;  %v71_v10 = vld [vmem:[#allocation2 + $0x8] sm:$0xff] }
  0x7d   :  { %1403 = vmatprep.mubr.msk.f32.mxu1 %vm39_vm0, %v76_v9  ;;  %1395 = vmatmul.mubr.msk.f32.vlgmr.msra.gmra.mrb[0].mxu0 %vm39_vm0, %v71_v10 }
  0x7e   :  { %1432 = vmatpush3.msra.mxu0 %v1670_v11 }
  0x7f   :  { %1441 = vmatprep.subr.mxu0 %v1573_v4 }
  0x81   :  { %v77_v12 = vld [vmem:[#allocation2 + $0x38] sm:$0xff] }
  0x82   :  { %1404 = vmatmul.mubr.msk.f32.vlgmr.msra.gmra.mrb[0].mxu1 %vm39_vm0, %v77_v12 }
  0x83   :  { %1407 = vmatpush3.msra.mxu1 %v1670_v11  ;;  %1408 = vmatprep.mubr.msk.f32.mxu1 %vm1574_vm1, %v1573_v4 }
  0x84   :  { %1411 = vmatprep.subr.mxu1 %v1573_v4 }
  0x86   :  { %1409 = vmatmul.mubr.f32.vlgmr.msra.gmra.mrb[2].mxu1 %v1573_v4 }
  0x87   :  { %1412 = vmatpush3.msra.mxu1 %v1670_v11  ;;  %1413 = vmatprep.mubr.msk.f32.mxu1 %vm1574_vm1, %v1573_v4 }
  0x88   :  { %1416 = vmatprep.subr.mxu1 %v1573_v4 }
 0x150   :  { %v1396_v13 = vpop.f32.mrb[0].mxu0 }
 0x151   :  { %v177_v14 = vpop.f32.mrb[1].mxu0  ;;  %v183_v42 = vadd.f32 %v1396_v13, %v1699_v21 }
 0x152   :  { %v178_v22 = vadd.f32 %v1699_v21, %v177_v14 }
 0x155   :  { %v1685_v15 = vpop.f32.mrb[0].mxu1 }
 0x156   :  { %v1687_v16 = vpop.f32.mrb[1].mxu1 }
 0x159   :  { %v294_v18 = vpop.f32.mrb[2].mxu1 }
 0x15a   :  { %v295_v19 = vadd.f32 %v1692_v17, %v294_v18  ;;  %v1410_v20 = vpop.f32.mrb[3].mxu1 }
 0x15c   :  { %306 = vrot.lane.b32.xlu1 %v295_v19, %s1571_s24  ;;  %v298_v23 = vadd.f32 %v295_v19, %v178_v22 }
 0x15e   :  { %v1326_v24 = vmul.f32 -1.442695, %v298_v23 }
 0x160   :  { %1510 = vpow2.f32 %v1326_v24 }
 0x16a   :  { %v1511_v25 = vpop.eup %1510 }
 0x16b   :  { %v302_v26 = vadd.f32 1.0, %v1511_v25 }
 0x16d   :  { %1512 = vrcp.f32 %v302_v26 }
 0x177   :  { %v1513_v27 = vpop.eup %1512 }
 0x178   :  { %v316_v33 = vsub.f32 1.0, %v1513_v27  ;;  %v322_v35 = vmul.f32 0.0, %v1513_v27 }
 0x1ce   :  { %v307_v28 = vpop.permute.xlu1 %306 }
 0x1cf   :  { %v309_v29 = vmul.f32 %v1513_v27, %v307_v28 }
 0x1d1   :  { %311 = vrot.lane.b32.xlu0 %v309_v29, %s1572_s0 }
 0x243   :  { %v312_v30 = vpop.permute.xlu0 %311 }
 0x244   :  { %v314_v31 = vadd.f32 %v312_v30, %v178_v22 }
 0x246   :  { %1514 = vtanh.f32 %v314_v31 }
 0x250   :  { %v1515_v32 = vpop.eup %1514 }
 0x251   :  { %318 = vrot.lane.b32.xlu1 %v1515_v32, %s1575_s4 }
 0x2c3   :  { %v319_v34 = vpop.permute.xlu1 %318 }
 0x2c4   :  { %v321_v36 = vmul.f32 %v319_v34, %v316_v33 }
 0x2c6   :  { %v323_v37 = vadd.f32 %v322_v35, %v321_v36 }
 0x2c8   :  { %325 = vrot.lane.b32.xlu0 %v323_v37, %s1575_s4 }
 0x33a   :  { %v326_v38 = vpop.permute.xlu0 %325 }
 0x33b   :  { %1414 = vmatmul.mubr.msk.f32.vlgmr.msra.gmra.mrb[4].mxu1 %vm224_vm2, %v326_v38 }
 0x33c   :  { %1417 = vmatpush3.msra.mxu1 %v1670_v11  ;;  %1418 = vmatprep.mubr.msk.f32.mxu1 %vm1574_vm1, %v1573_v4 }
 0x33d   :  { %1421 = vmatprep.subr.mxu1 %v1573_v4 }
 0x40e   :  { %v395_v39 = vpop.f32.mrb[4].mxu1 }
 0x40f   :  { %v396_v40 = vadd.f32 %v1692_v17, %v395_v39  ;;  %v1415_v41 = vpop.f32.mrb[5].mxu1 }
 0x411   :  { %407 = vrot.lane.b32.xlu1 %v396_v40, %s1571_s24  ;;  %v399_v43 = vadd.f32 %v396_v40, %v183_v42 }
 0x413   :  { %v1328_v44 = vmul.f32 -1.442695, %v399_v43 }
 0x415   :  { %1516 = vpow2.f32 %v1328_v44 }
 0x41f   :  { %v1517_v45 = vpop.eup %1516 }
 0x420   :  { %v403_v46 = vadd.f32 1.0, %v1517_v45 }
 0x422   :  { %1518 = vrcp.f32 %v403_v46 }
 0x42c   :  { %v1519_v47 = vpop.eup %1518 }
 0x42d   :  { %v417_v53 = vsub.f32 1.0, %v1519_v47  ;;  %v423_v55 = vmul.f32 %v1519_v47, %v323_v37 }
 0x483   :  { %v408_v48 = vpop.permute.xlu1 %407 }
 0x484   :  { %v410_v49 = vmul.f32 %v1519_v47, %v408_v48 }
 0x486   :  { %412 = vrot.lane.b32.xlu0 %v410_v49, %s1572_s0 }
 0x4f8   :  { %v413_v50 = vpop.permute.xlu0 %412 }
 0x4f9   :  { %v415_v51 = vadd.f32 %v413_v50, %v183_v42 }
 0x4fb   :  { %1520 = vtanh.f32 %v415_v51 }
 0x505   :  { %v1521_v52 = vpop.eup %1520 }
 0x506   :  { %419 = vrot.lane.b32.xlu1 %v1521_v52, %s1575_s4 }
 0x50a   :  { %46 = vrot.lane.b32.xlu1 %v1645_v0, %s1576_s3 }
 0x578   :  { %v420_v54 = vpop.permute.xlu1 %419 }
 0x579   :  { %v422_v56 = vmul.f32 %v420_v54, %v417_v53 }
 0x57b   :  { %v424_v57 = vadd.f32 %v423_v55, %v422_v56 }
 0x57c   :  { %v47_v58 = vpop.permute.xlu1 %46 }
 0x57d   :  { %426 = vrot.lane.b32.xlu0 %v424_v57, %s1575_s4  ;;  %49 = vst.msk [vmem:[#allocation2 + $0x10] sm:$0xff] %vm39_vm0, %v47_v58 }
 0x581   :  { %50 = vrot.lane.b32.xlu0 %v1645_v0, %s1577_s29 }
 0x584   :  { %v72_v59 = vld [vmem:[#allocation2 + $0x10] sm:$0xff] }
 0x585   :  { %1397 = vmatprep.mubr.msk.f32.mxu0 %vm39_vm0, %v72_v59 }
 0x5ef   :  { %v427_v60 = vpop.permute.xlu0 %426 }
 0x5f0   :  { %1419 = vmatmul.mubr.msk.f32.vlgmr.msra.gmra.mrb[6].mxu1 %vm224_vm2, %v427_v60 }
 0x5f1   :  { %1422 = vmatpush3.msra.mxu1 %v1670_v11  ;;  %1423 = vmatprep.mubr.msk.f32.mxu1 %vm1574_vm1, %v1573_v4 }
 0x5f2   :  { %1426 = vmatprep.subr.mxu1 %v1573_v4 }
 0x5f3   :  { %v51_v61 = vpop.permute.xlu0 %50 }
 0x5f4   :  { %53 = vst.msk [vmem:[#allocation2 + $0x18] sm:$0xff] %vm39_vm0, %v51_v61 }
 0x5fb   :  { %v73_v62 = vld [vmem:[#allocation2 + $0x18] sm:$0xff] }
 0x5fc   :  { %1398 = vmatmul.mubr.msk.f32.gmra.mrb[2].mxu0 %vm39_vm0, %v73_v62 }
 0x6c3   :  { %v496_v63 = vpop.f32.mrb[6].mxu1 }
 0x6c4   :  { %v497_v1 = vadd.f32 %v1692_v17, %v496_v63  ;;  %v1420_v2 = vpop.f32.mrb[7].mxu1 }
 0x6c6   :  { %508 = vrot.lane.b32.xlu1 %v497_v1, %s1571_s24 }
 0x6cf   :  { %v1399_v3 = vpop.f32.mrb[2].mxu0 }
 0x6d0   :  { %v187_v5 = vpop.f32.mrb[3].mxu0  ;;  %v193_v31 = vadd.f32 %v1399_v3, %v1699_v21 }
 0x6d1   :  { %v188_v6 = vadd.f32 %v1699_v21, %v187_v5 }
 0x6d3   :  { %v500_v7 = vadd.f32 %v497_v1, %v188_v6 }
 0x6d5   :  { %v1330_v8 = vmul.f32 -1.442695, %v500_v7 }
 0x6d7   :  { %1522 = vpow2.f32 %v1330_v8 }
 0x6e1   :  { %v1523_v9 = vpop.eup %1522 }
 0x6e2   :  { %v504_v10 = vadd.f32 1.0, %v1523_v9 }
 0x6e4   :  { %1524 = vrcp.f32 %v504_v10 }
 0x6ee   :  { %v1525_v12 = vpop.eup %1524 }
 0x6ef   :  { %v518_v22 = vsub.f32 1.0, %v1525_v12  ;;  %v524_v24 = vmul.f32 %v1525_v12, %v424_v57 }
 0x738   :  { %v509_v13 = vpop.permute.xlu1 %508 }
 0x739   :  { %v511_v14 = vmul.f32 %v1525_v12, %v509_v13 }
 0x73b   :  { %513 = vrot.lane.b32.xlu0 %v511_v14, %s1572_s0 }
 0x7ad   :  { %v514_v18 = vpop.permute.xlu0 %513 }
 0x7ae   :  { %v516_v19 = vadd.f32 %v514_v18, %v188_v6 }
 0x7b0   :  { %1526 = vtanh.f32 %v516_v19 }
 0x7ba   :  { %v1527_v20 = vpop.eup %1526 }
 0x7bb   :  { %520 = vrot.lane.b32.xlu1 %v1527_v20, %s1575_s4 }
 0x82d   :  { %v521_v23 = vpop.permute.xlu1 %520 }
 0x82e   :  { %v523_v25 = vmul.f32 %v521_v23, %v518_v22 }
 0x830   :  { %v525_v26 = vadd.f32 %v524_v24, %v523_v25 }
 0x832   :  { %527 = vrot.lane.b32.xlu0 %v525_v26, %s1575_s4 }
 0x8a4   :  { %v528_v27 = vpop.permute.xlu0 %527 }
 0x8a5   :  { %1424 = vmatmul.mubr.msk.f32.vlgmr.msra.gmra.mrb[8].mxu1 %vm224_vm2, %v528_v27 }
 0x8a6   :  { %1427 = vmatpush3.msra.mxu1 %v1670_v11  ;;  %1428 = vmatprep.mubr.msk.f32.mxu1 %vm1574_vm1, %v1573_v4 }
 0x8a7   :  { %1436 = vmatprep.subr.mxu1 %v1573_v4 }
 0x978   :  { %v597_v28 = vpop.f32.mrb[8].mxu1 }
 0x979   :  { %v598_v29 = vadd.f32 %v1692_v17, %v597_v28  ;;  %v1425_v30 = vpop.f32.mrb[9].mxu1 }
 0x97b   :  { %609 = vrot.lane.b32.xlu1 %v598_v29, %s1571_s24  ;;  %v601_v32 = vadd.f32 %v598_v29, %v193_v31 }
 0x97d   :  { %v1332_v33 = vmul.f32 -1.442695, %v601_v32 }
 0x97f   :  { %1528 = vpow2.f32 %v1332_v33 }
 0x989   :  { %v1529_v34 = vpop.eup %1528 }
 0x98a   :  { %v605_v35 = vadd.f32 1.0, %v1529_v34 }
 0x98c   :  { %1530 = vrcp.f32 %v605_v35 }
 0x996   :  { %v1531_v36 = vpop.eup %1530 }
 0x997   :  { %v619_v42 = vsub.f32 1.0, %v1531_v36  ;;  %v625_v44 = vmul.f32 %v1531_v36, %v525_v26 }
 0x9ed   :  { %v610_v37 = vpop.permute.xlu1 %609 }
 0x9ee   :  { %v612_v38 = vmul.f32 %v1531_v36, %v610_v37 }
 0x9f0   :  { %614 = vrot.lane.b32.xlu0 %v612_v38, %s1572_s0  ;;  %v208_v38 = vadd.f32 %v1699_v21, %v1687_v16 }
 0xa62   :  { %v615_v39 = vpop.permute.xlu0 %614 }
 0xa63   :  { %v617_v40 = vadd.f32 %v615_v39, %v193_v31 }
 0xa65   :  { %1532 = vtanh.f32 %v617_v40 }
 0xa6f   :  { %v1533_v41 = vpop.eup %1532 }
 0xa70   :  { %621 = vrot.lane.b32.xlu1 %v1533_v41, %s1575_s4 }
 0xa74   :  { %54 = vrot.lane.b32.xlu1 %v1645_v0, %s1578_s30 }
 0xae2   :  { %v622_v43 = vpop.permute.xlu1 %621 }
 0xae3   :  { %v624_v45 = vmul.f32 %v622_v43, %v619_v42 }
 0xae5   :  { %v626_v46 = vadd.f32 %v625_v44, %v624_v45 }
 0xae6   :  { %v55_v47 = vpop.permute.xlu1 %54 }
 0xae7   :  { %628 = vrot.lane.b32.xlu0 %v626_v46, %s1575_s4  ;;  %57 = vst.msk [vmem:[#allocation2 + $0x20] sm:$0xff] %vm39_vm0, %v55_v47 }
 0xaeb   :  { %58 = vrot.lane.b32.xlu0 %v1645_v0, %s1579_s12 }
 0xaee   :  { %v74_v48 = vld [vmem:[#allocation2 + $0x20] sm:$0xff] }
 0xaef   :  { %1400 = vmatprep.mubr.msk.f32.mxu0 %vm39_vm0, %v74_v48 }
 0xb59   :  { %v629_v49 = vpop.permute.xlu0 %628 }
 0xb5a   :  { %1429 = vmatmul.mubr.msk.f32.vlgmr.msra.gmra.mrb[10].mxu1 %vm224_vm2, %v629_v49 }
 0xb5b   :  { %1437 = vmatpush3.msra.mxu1 %v1670_v11  ;;  %1438 = vmatprep.mubr.msk.f32.mxu1 %vm1574_vm1, %v1573_v4 }
 0xb5c   :  { %1446 = vmatprep.subr.mxu1 %v1573_v4 }
 0xb5d   :  { %v59_v50 = vpop.permute.xlu0 %58 }
 0xb5e   :  { %61 = vst.msk [vmem:[#allocation2 + $0x28] sm:$0xff] %vm39_vm0, %v59_v50 }
 0xb65   :  { %v75_v51 = vld [vmem:[#allocation2 + $0x28] sm:$0xff] }
 0xb66   :  { %1401 = vmatmul.mubr.msk.f32.gmra.mrb[4].mxu0 %vm39_vm0, %v75_v51 }
 0xb67   :  { %1433 = vmatprep.mubr.msk.f32.mxu0 %vm1574_vm1, %v1573_v4 }
 0xc2d   :  { %v698_v0 = vpop.f32.mrb[10].mxu1 }
 0xc2e   :  { %v699_v52 = vadd.f32 %v1692_v17, %v698_v0  ;;  %v1430_v53 = vpop.f32.mrb[11].mxu1 }
 0xc30   :  { %710 = vrot.lane.b32.xlu1 %v699_v52, %s1571_s24 }
 0xc39   :  { %v1402_v54 = vpop.f32.mrb[4].mxu0 }
 0xc3a   :  { %v197_v55 = vpop.f32.mrb[5].mxu0  ;;  %v203_v18 = vadd.f32 %v1402_v54, %v1699_v21 }
 0xc3b   :  { %v198_v56 = vadd.f32 %v1699_v21, %v197_v55 }
 0xc3d   :  { %v702_v57 = vadd.f32 %v699_v52, %v198_v56 }
 0xc3f   :  { %v1334_v58 = vmul.f32 -1.442695, %v702_v57 }
 0xc41   :  { %1534 = vpow2.f32 %v1334_v58 }
 0xc4b   :  { %v1535_v59 = vpop.eup %1534 }
 0xc4c   :  { %v706_v60 = vadd.f32 1.0, %v1535_v59 }
 0xc4e   :  { %1536 = vrcp.f32 %v706_v60 }
 0xc58   :  { %v1537_v61 = vpop.eup %1536 }
 0xc59   :  { %v720_v5 = vsub.f32 1.0, %v1537_v61  ;;  %v726_v7 = vmul.f32 %v1537_v61, %v626_v46 }
 0xca2   :  { %v711_v62 = vpop.permute.xlu1 %710 }
 0xca3   :  { %v713_v63 = vmul.f32 %v1537_v61, %v711_v62 }
 0xca5   :  { %715 = vrot.lane.b32.xlu0 %v713_v63, %s1572_s0 }
 0xd17   :  { %v716_v1 = vpop.permute.xlu0 %715 }
 0xd18   :  { %v718_v2 = vadd.f32 %v716_v1, %v198_v56  ;;  %v213_v56 = vadd.f32 %v1685_v15, %v1699_v21  ;;  %v1037_v15 = vld [vmem:[%s1855_s5] sm:$0xff] }
 0xd1a   :  { %1538 = vtanh.f32 %v718_v2 }
 0xd24   :  { %v1539_v3 = vpop.eup %1538 }
 0xd25   :  { %722 = vrot.lane.b32.xlu1 %v1539_v3, %s1575_s4 }
 0xd97   :  { %v723_v6 = vpop.permute.xlu1 %722 }
 0xd98   :  { %v725_v8 = vmul.f32 %v723_v6, %v720_v5 }
 0xd9a   :  { %v727_v9 = vadd.f32 %v726_v7, %v725_v8 }
 0xd9c   :  { %729 = vrot.lane.b32.xlu0 %v727_v9, %s1575_s4 }
 0xe0e   :  { %v730_v10 = vpop.permute.xlu0 %729 }
 0xe0f   :  { %1434 = vmatmul.mubr.msk.f32.vlgmr.msra.gmra.mrb[6].mxu0 %vm224_vm2, %v730_v10 }
 0xe10   :  { %1442 = vmatpush3.msra.mxu0 %v1670_v11  ;;  %1443 = vmatprep.mubr.msk.f32.mxu0 %vm1574_vm1, %v1573_v4 }
 0xee2   :  { %v799_v12 = vpop.f32.mrb[6].mxu0 }
 0xee3   :  { %v800_v13 = vadd.f32 %v1692_v17, %v799_v12  ;;  %v1435_v14 = vpop.f32.mrb[7].mxu0 }
 0xee4   :  { %v1126_v14 = vld [vmem:[%s1857_s7] sm:$0xff] }
 0xee5   :  { %811 = vrot.lane.b32.xlu1 %v800_v13, %s1571_s24  ;;  %v803_v19 = vadd.f32 %v800_v13, %v203_v18 }
 0xee7   :  { %v1336_v20 = vmul.f32 -1.442695, %v803_v19 }
 0xee9   :  { %1540 = vpow2.f32 %v1336_v20  ;;  %v1580_v20 = vmov 0.0|0.0  }
 0xeea   :  { %1481 = vmatprep.subr.bf16.mxu0 %v1580_v20 }
 0xef3   :  { %v1541_v22 = vpop.eup %1540 }
 0xef4   :  { %v807_v23 = vadd.f32 1.0, %v1541_v22  ;;  %v1128_v22 = vld [vmem:[%s1857_s7 + $0x10] sm:$0xff] }
 0xef6   :  { %1542 = vrcp.f32 %v807_v23 }
 0xf00   :  { %v1543_v24 = vpop.eup %1542 }
 0xf01   :  { %v821_v29 = vsub.f32 1.0, %v1543_v24  ;;  %v827_v31 = vmul.f32 %v1543_v24, %v727_v9 }
 0xf57   :  { %v812_v25 = vpop.permute.xlu1 %811 }
 0xf58   :  { %v814_v11 = vmul.f32 %v1543_v24, %v812_v25  ;;  %v1130_v24 = vld [vmem:[%s1857_s7 + $0x20] sm:$0xff]  ;;  %v1131_v25 = vld [vmem:[%s1857_s7 + $0x28] sm:$0xff] }
 0xf5a   :  { %816 = vrot.lane.b32.xlu0 %v814_v11, %s1572_s0  ;;  %v1488_v11 = vpack.c.bf16 %v1131_v25, %v1130_v24 }
 0xfcc   :  { %v817_v26 = vpop.permute.xlu0 %816 }
 0xfcd   :  { %v819_v27 = vadd.f32 %v817_v26, %v203_v18  ;;  %v1127_v18 = vld [vmem:[%s1857_s7 + $0x8] sm:$0xff]  ;;  %v1132_v26 = vld [vmem:[%s1857_s7 + $0x30] sm:$0xff] }
 0xfce   :  { %v1482_v19 = vpack.c.bf16 %v1127_v18, %v1126_v14 }
 0xfcf   :  { %1544 = vtanh.f32 %v819_v27  ;;  %v1133_v27 = vld [vmem:[%s1857_s7 + $0x38] sm:$0xff] }
 0xfd9   :  { %v1545_v28 = vpop.eup %1544 }
 0xfda   :  { %823 = vrot.lane.b32.xlu1 %v1545_v28, %s1575_s4  ;;  %v1491_v28 = vpack.c.bf16 %v1133_v27, %v1132_v26 }
0x104c   :  { %v824_v30 = vpop.permute.xlu1 %823 }
0x104d   :  { %v826_v32 = vmul.f32 %v824_v30, %v821_v29  ;;  %v1342_v29 = vld [vmem:[%s1858_s6] ss:$0 sm:$0xff] }
0x104f   :  { %v828_v33 = vadd.f32 %v827_v31, %v826_v32 }
0x1051   :  { %830 = vrot.lane.b32.xlu0 %v828_v33, %s1575_s4 }
0x10c3   :  { %v831_v34 = vpop.permute.xlu0 %830 }
0x10c4   :  { %1439 = vmatmul.mubr.msk.f32.vlgmr.msra.gmra.mrb[12].mxu1 %vm224_vm2, %v831_v34 }
0x10c5   :  { %1448 = vmatprep.mubr.msk.f32.mxu1 %vm1574_vm1, %v1573_v4  ;;  %1447 = vmatpush3.msra.mxu1 %v1037_v15 }
0x10c6   :  { %1493 = vmatprep.subr.bf16.mxu1 %v1580_v20 }
0x1197   :  { %v900_v35 = vpop.f32.mrb[12].mxu1 }
0x1198   :  { %v901_v36 = vadd.f32 %v1692_v17, %v900_v35  ;;  %v1440_v37 = vpop.f32.mrb[13].mxu1 }
0x1199   :  { %v1221_v37 = vld [vmem:[%s1859_s9] sm:$0xff] }
0x119a   :  { %912 = vrot.lane.b32.xlu1 %v901_v36, %s1571_s24  ;;  %v904_v39 = vadd.f32 %v901_v36, %v208_v38 }
0x119c   :  { %v1338_v40 = vmul.f32 -1.442695, %v904_v39 }
0x119e   :  { %1546 = vpow2.f32 %v1338_v40  ;;  %v1345_v40 = vld [vmem:[%s1860_s8] ss:$0 sm:$0xff] }
0x11a8   :  { %v1547_v41 = vpop.eup %1546 }
0x11a9   :  { %v908_v42 = vadd.f32 1.0, %v1547_v41 }
0x11ab   :  { %1548 = vrcp.f32 %v908_v42 }
0x11b5   :  { %v1549_v43 = vpop.eup %1548 }
0x11b6   :  { %v922_v49 = vsub.f32 1.0, %v1549_v43  ;;  %v928_v16 = vmul.f32 %v1549_v43, %v828_v33 }
0x120c   :  { %v913_v44 = vpop.permute.xlu1 %912 }
0x120d   :  { %v915_v45 = vmul.f32 %v1549_v43, %v913_v44 }
0x120f   :  { %917 = vrot.lane.b32.xlu0 %v915_v45, %s1572_s0 }
0x1281   :  { %v918_v46 = vpop.permute.xlu0 %917 }
0x1282   :  { %v920_v47 = vadd.f32 %v918_v46, %v208_v38  ;;  %v1222_v38 = vld [vmem:[%s1859_s9 + $0x8] sm:$0xff]  ;;  %s1581_s9 = smov 8  }
0x1283   :  { %v1494_v39 = vpack.c.bf16 %v1222_v38, %v1221_v37 }
0x1284   :  { %1550 = vtanh.f32 %v920_v47 }
0x128e   :  { %v1551_v48 = vpop.eup %1550 }
0x128f   :  { %924 = vrot.lane.b32.xlu1 %v1551_v48, %s1575_s4  ;;  %v1348_v48 = vld [vmem:[%s1861_s10] ss:$0 sm:$0xff] }
0x1301   :  { %v925_v50 = vpop.permute.xlu1 %924 }
0x1302   :  { %v927_v51 = vmul.f32 %v925_v50, %v922_v49 }
0x1304   :  { %v929_v0 = vadd.f32 %v928_v16, %v927_v51 }
0x1306   :  { %931 = vrot.lane.b32.xlu0 %v929_v0, %s1575_s4 }
0x1378   :  { %v932_v52 = vpop.permute.xlu0 %931 }
0x1379   :  { %1444 = vmatmul.mubr.msk.f32.vlgmr.msra.gmra.mrb[8].mxu0 %vm224_vm2, %v932_v52 }
0x137a   :  { %1467 = vmatprep.mubr.msk.f32.mxu0 %vm1574_vm1, %v1573_v4  ;;  %1483 = vmatpush3.bf16.msra.mxu0 %v1482_v19 }
0x137b   :  { %1484 = vmatprep.subr.bf16.mxu0 %v1580_v20 }
0x144c   :  { %v1001_v53 = vpop.f32.mrb[8].mxu0 }
0x144d   :  { %v1002_v54 = vadd.f32 %v1692_v17, %v1001_v53  ;;  %v1445_v55 = vpop.f32.mrb[9].mxu0 }
0x144f   :  { %1013 = vrot.lane.b32.xlu1 %v1002_v54, %s1571_s24  ;;  %v1005_v57 = vadd.f32 %v1002_v54, %v213_v56 }
0x1451   :  { %v1340_v58 = vmul.f32 -1.442695, %v1005_v57 }
0x1453   :  { %1552 = vpow2.f32 %v1340_v58 }
0x145d   :  { %v1553_v59 = vpop.eup %1552 }
0x145e   :  { %v1009_v60 = vadd.f32 1.0, %v1553_v59 }
0x1460   :  { %1554 = vrcp.f32 %v1009_v60 }
0x146a   :  { %v1555_v61 = vpop.eup %1554 }
0x146b   :  { %v1023_v21 = vsub.f32 1.0, %v1555_v61  ;;  %v1029_v5 = vmul.f32 %v1555_v61, %v929_v0 }
0x14c1   :  { %v1014_v62 = vpop.permute.xlu1 %1013 }
0x14c2   :  { %v1016_v63 = vmul.f32 %v1555_v61, %v1014_v62 }
0x14c4   :  { %1018 = vrot.lane.b32.xlu0 %v1016_v63, %s1572_s0 }
0x1536   :  { %v1019_v1 = vpop.permute.xlu0 %1018 }
0x1537   :  { %v1021_v2 = vadd.f32 %v1019_v1, %v213_v56 }
0x1539   :  { %1556 = vtanh.f32 %v1021_v2 }
0x1543   :  { %v1557_v17 = vpop.eup %1556 }
0x1544   :  { %1025 = vrot.lane.b32.xlu1 %v1557_v17, %s1575_s4 }
0x15b6   :  { %v1026_v3 = vpop.permute.xlu1 %1025 }
0x15b7   :  { %v1028_v6 = vmul.f32 %v1026_v3, %v1023_v21 }
0x15b9   :  { %v1030_v7 = vadd.f32 %v1029_v5, %v1028_v6 }
0x15bb   :  { %v1341_v8 = vmul.f32 -1.442695, %v1030_v7 }
0x15bd   :  { %1558 = vpow2.f32 %v1341_v8 }
0x15c7   :  { %v1559_v9 = vpop.eup %1558 }
0x15c8   :  { %v1034_v10 = vadd.f32 1.0, %v1559_v9 }
0x15ca   :  { %1560 = vrcp.f32 %v1034_v10 }
0x15d4   :  { %v1561_v12 = vpop.eup %1560 }
0x15d5   :  { %1046 = vrot.lane.b32.xlu0 %v1561_v12, %s1575_s4 }
0x1647   :  { %v1047_v13 = vpop.permute.xlu0 %1046 }
0x1648   :  { %1305 = vst.msk [vmem:[%s1856_s11] sm:$0xff] %vm224_vm2, %v1047_v13  ;;  %1449 = vmatmul.mubr.msk.f32.vlgmr.msra.gmra.mrb[14].mxu1 %vm224_vm2, %v1047_v13 }
0x1649   :  { %1474 = vmatprep.mubr.msk.f32.mxu1 %vm1574_vm1, %v1573_v4  ;;  %v1129_v4 = vld [vmem:[%s1857_s7 + $0x18] sm:$0xff]  ;;  %1495 = vmatpush3.bf16.msra.mxu1 %v1494_v39 }
0x164a   :  { %v1485_v23 = vpack.c.bf16 %v1129_v4, %v1128_v22 }
0x164c   :  { %1486 = vmatpush3.bf16.msra.mxu0 %v1485_v23 }
0x164d   :  { %1487 = vmatprep.subr.bf16.mxu0 %v1580_v20 }
0x1650   :  { %1489 = vmatpush3.bf16.msra.mxu0 %v1488_v11 }
0x1651   :  { %1490 = vmatprep.subr.bf16.mxu0 %v1580_v20 }
0x1654   :  { %1492 = vmatpush3.bf16.msra.mxu0 %v1491_v28 }
0x171b   :  { %v1116_v30 = vpop.f32.mrb[14].mxu1 }
0x171c   :  { %v1117_v31 = vadd.f32 %v1342_v29, %v1116_v30  ;;  %v1450_v32 = vpop.f32.mrb[15].mxu1 }
0x171e   :  { %v1344_v33 = vmul.f32 -1.442695, %v1117_v31 }
0x1720   :  { %1562 = vpow2.f32 %v1344_v33 }
0x172a   :  { %v1563_v34 = vpop.eup %1562 }
0x172b   :  { %v1123_v35 = vadd.f32 1.0, %v1563_v34 }
0x172d   :  { %1564 = vrcp.f32 %v1123_v35 }
0x1737   :  { %v1565_v36 = vpop.eup %1564 }
0x1738   :  { %1468 = vmatmul.mubr.msk.f32.vlgmr.msra.gmra.mrb[10].mxu0 %vm1141_vm3, %v1565_v36 }
0x180b   :  { %v1211_v41 = vpop.f32.mrb[10].mxu0 }
0x180c   :  { %v1212_v42 = vadd.f32 %v1345_v40, %v1211_v41  ;;  %v1469_v43 = vpop.f32.mrb[11].mxu0 }
0x180e   :  { %v1347_v44 = vmul.f32 -1.442695, %v1212_v42 }
0x1810   :  { %1566 = vpow2.f32 %v1347_v44 }
0x181a   :  { %v1567_v45 = vpop.eup %1566 }
0x181b   :  { %v1218_v46 = vadd.f32 1.0, %v1567_v45 }
0x181d   :  { %1568 = vrcp.f32 %v1218_v46 }
0x1827   :  { %v1569_v47 = vpop.eup %1568 }
0x1828   :  { %1475 = vmatmul.mubr.msk.f32.vlgmr.msra.gmra.mrb[16].mxu1 %vm39_vm0, %v1569_v47 }
0x18fb   :  { %v1299_v49 = vpop.f32.mrb[16].mxu1 }
0x18fc   :  { %v1300_v50 = vadd.f32 %v1348_v48, %v1299_v49  ;;  %v1476_v16 = vpop.f32.mrb[17].mxu1 }
0x18fe   :  { %1307 = vrot.lane.b32.xlu1 %v1300_v50, %s1581_s9 }
0x1970   :  { %v1308_v51 = vpop.permute.xlu1 %1307 }
0x1971   :  { %1311 = vst.msk [vmem:[%s1856_s11] sm:$0xff] %vm1310_vm4, %v1308_v51 }

</bundles_post_ra>
